<compile_context>
chip_gen: v7x
topology: tpu7x:2x2x1
jax: 0.10.0
libtpu: 0.0.40
codegen_flags: <defaults>
</compile_context>

<pallas_src>
import functools

import jax
import jax.numpy as jnp
from jax.experimental import pallas as pl
from jax.experimental.pallas import tpu as pltpu


def _ytmt_head_kernel_split(l_ref, r_ref, wlt_ref, wlb_ref, wrt_ref, wrb_ref,
                            bl_ref, br_ref, ol_ref, or_ref):
    """4-dot path (used when C % 8 != 0). Blocks: act (1,C,TM), w (C,C), b (C,1)."""
    lp = jnp.maximum(l_ref[0], 0.0)          # (C, TM) = relu(input_l)
    rp = jnp.maximum(r_ref[0], 0.0)          # (C, TM) = relu(input_r)

    # fusion_l(cat([relu(l), relu(r)])) == Wl_top @ relu(l) + Wl_bot @ relu(r)
    out_l = (jnp.dot(wlt_ref[...], lp, preferred_element_type=jnp.float32)
             + jnp.dot(wlb_ref[...], rp, preferred_element_type=jnp.float32)
             + bl_ref[...])
    # fusion_r(cat([relu(r), relu(l)])) == Wr_top @ relu(r) + Wr_bot @ relu(l)
    out_r = (jnp.dot(wrt_ref[...], rp, preferred_element_type=jnp.float32)
             + jnp.dot(wrb_ref[...], lp, preferred_element_type=jnp.float32)
             + br_ref[...])

    ol_ref[0] = out_l.astype(ol_ref.dtype)
    or_ref[0] = out_r.astype(or_ref.dtype)


def _ytmt_head_kernel_stacked(l_ref, r_ref, wt_ref, wb_ref, b_ref,
                              ol_ref, or_ref):
    """2-dot path (C % 8 == 0). wt/wb: (2C,C), b: (2C,1); act blocks (1,C,TM)."""
    c = ol_ref.shape[1]
    lp = jnp.maximum(l_ref[0], 0.0)          # (C, TM) = relu(input_l)
    rp = jnp.maximum(r_ref[0], 0.0)          # (C, TM) = relu(input_r)

    # rows [:C]  -> out_l = wl_top@lp + wl_bot@rp + b_l
    # rows [C:]  -> out_r = wr_bot@lp + wr_top@rp + b_r
    out = (jnp.dot(wt_ref[...], lp, preferred_element_type=jnp.float32)
           + jnp.dot(wb_ref[...], rp, preferred_element_type=jnp.float32)
           + b_ref[...])

    ol_ref[0] = out[:c].astype(ol_ref.dtype)
    or_ref[0] = out[c:].astype(or_ref.dtype)


@functools.partial(jax.jit, static_argnames=("tm",))
def positive_ytmt_head(input_l, input_r, w_l, b_l, w_r, b_r, *, tm=None):
    """input_l/input_r: NCHW. w_*: (C, 2C, 1, 1). b_*: (C,)."""
    n, c, h, w = input_l.shape
    hw = h * w
    itemsize = jnp.dtype(input_l.dtype).itemsize

    # NCHW -> (N, C, H*W) is a free view (contiguous last two dims).
    l3 = input_l.reshape(n, c, hw)
    r3 = input_r.reshape(n, c, hw)

    # --- spatial (lane) tile selection -------------------------------------
    # Memory-bound op: biggest tile that keeps the (2 in + 2 out) double-
    # buffered activation streams inside ~24 MiB (fits v7x's 64 MiB/TC VMEM),
    # capped at 8192 lanes.  No padding: non-divisible spatial sizes use a
    # ceil-div grid and Pallas masked edge blocks.
    if tm is None:
        tm = min(8192, max(128, (24 << 20) // (8 * c * itemsize)))
        tm = max(128, (tm // 128) * 128)
        if hw % 128 == 0:
            tm = min(tm, hw)
            # Keep >= 2 spatial steps on batch-1 shapes so v7x's second
            # TensorCore isn't starved (both grid axes are "parallel").
            if n < 2 and hw >= 256:
                tm = min(tm, max(128, ((hw // 2) // 128) * 128))
        elif hw <= tm:
            tm = hw          # full-extent block (allowed even if not 128-mult)
        # else: tm stays a 128-multiple; the last (partial) block is masked.

    grid = (n, pl.cdiv(hw, tm))

    # --- weights: (C, 2C, 1, 1) -> (C, 2C), split per concat input ----------
    wl2d = w_l.reshape(c, 2 * c)
    wr2d = w_r.reshape(c, 2 * c)
    wl_top, wl_bot = wl2d[:, :c], wl2d[:, c:]    # act on relu(l), relu(r)
    wr_top, wr_bot = wr2d[:, :c], wr2d[:, c:]    # act on relu(r), relu(l)

    act_spec = pl.BlockSpec((1, c, tm), lambda i, j: (i, 0, j))

    if c % 8 == 0:
        # Stack output channels: 2 MXU dots per step instead of 4.
        w_top = jnp.concatenate([wl_top, wr_bot], axis=0)      # (2C, C) on relu(l)
        w_bot = jnp.concatenate([wl_bot, wr_top], axis=0)      # (2C, C) on relu(r)
        b_stack = jnp.concatenate([b_l, b_r]).reshape(2 * c, 1)
        kernel = _ytmt_head_kernel_stacked
        operands = (l3, r3, w_top, w_bot, b_stack)
        in_specs = [act_spec, act_spec,
                    pl.BlockSpec((2 * c, c), lambda i, j: (0, 0)),
                    pl.BlockSpec((2 * c, c), lambda i, j: (0, 0)),
                    pl.BlockSpec((2 * c, 1), lambda i, j: (0, 0))]
        weight_bytes = (2 * (2 * c * c) + 2 * c) * 4
    else:
        kernel = _ytmt_head_kernel_split
        operands = (l3, r3, wl_top, wl_bot, wr_top, wr_bot,
                    b_l.reshape(c, 1), b_r.reshape(c, 1))
        w_spec = pl.BlockSpec((c, c), lambda i, j: (0, 0))
        b_spec = pl.BlockSpec((c, 1), lambda i, j: (0, 0))
        in_specs = [act_spec, act_spec, w_spec, w_spec, w_spec, w_spec,
                    b_spec, b_spec]
        weight_bytes = (4 * c * c + 2 * c) * 4

    # VMEM budget derived from actual usage: 4 activation streams x 2 buffers,
    # weights (x2 for buffering), plus slack.  Kept <= 64 MiB (v7x per-TC cap).
    vmem_bytes = 4 * 2 * c * tm * itemsize + 2 * weight_bytes + (2 << 20)
    vmem_bytes = min(max(vmem_bytes, 4 << 20), 64 << 20)

    out_l3, out_r3 = pl.pallas_call(
        kernel,
        out_shape=(jax.ShapeDtypeStruct((n, c, hw), input_l.dtype),
                   jax.ShapeDtypeStruct((n, c, hw), input_r.dtype)),
        grid_spec=pltpu.PrefetchScalarGridSpec(
            num_scalar_prefetch=0,
            grid=grid,
            in_specs=in_specs,
            out_specs=[act_spec, act_spec],
        ),
        compiler_params=pltpu.CompilerParams(
            dimension_semantics=("parallel", "parallel"),
            vmem_limit_bytes=vmem_bytes),
    )(*operands)

    return out_l3.reshape(n, c, h, w), out_r3.reshape(n, c, h, w)


def _reference(input_l, input_r, w_l, b_l, w_r, b_r):
    """Pure-JAX reference matching the PyTorch forward (both branches ReLU)."""
    lp = jnp.maximum(input_l, 0.0)
    rp = jnp.maximum(input_r, 0.0)
    cat_l = jnp.concatenate([lp, rp], axis=1)   # (N, 2C, H, W)
    cat_r = jnp.concatenate([rp, lp], axis=1)
    wl2d = w_l.reshape(w_l.shape[0], -1)        # (C, 2C)
    wr2d = w_r.reshape(w_r.shape[0], -1)
    out_l = jnp.einsum("nchw,oc->nohw", cat_l, wl2d) + b_l[None, :, None, None]
    out_r = jnp.einsum("nchw,oc->nohw", cat_r, wr2d) + b_r[None, :, None, None]
    return out_l, out_r


def _make_params(key, c, dtype=jnp.float32):
    kwl, kbl, kwr, kbr = jax.random.split(key, 4)
    w_l = jax.random.normal(kwl, (c, 2 * c, 1, 1), dtype=dtype) * 0.1
    b_l = jax.random.normal(kbl, (c,), dtype=dtype) * 0.1
    w_r = jax.random.normal(kwr, (c, 2 * c, 1, 1), dtype=dtype) * 0.1
    b_r = jax.random.normal(kbr, (c,), dtype=dtype) * 0.1
    return w_l, b_l, w_r, b_r


if __name__ == "__main__":
    key = jax.random.PRNGKey(0)
    k1, k2, k3 = jax.random.split(key, 3)

    # --- Test 1: C=4 (split-weight 4-dot kernel), spatial tile divides H*W ---
    N, C, H, W = 2, 4, 16, 16
    kx, ky = jax.random.split(k1)
    input_l = jax.random.normal(kx, (N, C, H, W), dtype=jnp.float32)
    input_r = jax.random.normal(ky, (N, C, H, W), dtype=jnp.float32)
    w_l, b_l, w_r, b_r = _make_params(k2, C)

    out_l, out_r = positive_ytmt_head(input_l, input_r, w_l, b_l, w_r, b_r)
    jax.block_until_ready((out_l, out_r))
    ref_l, ref_r = _reference(input_l, input_r, w_l, b_l, w_r, b_r)
    assert out_l.shape == (N, C, H, W) and out_r.shape == (N, C, H, W)
    assert jnp.allclose(out_l, ref_l, atol=1e-5, rtol=1e-5)
    assert jnp.allclose(out_r, ref_r, atol=1e-5, rtol=1e-5)

    # --- Test 2: C=8 (stacked 2-dot kernel), H*W=400 not a 128 multiple ------
    # Forced tm=128 exercises the no-pad ceil-div grid with a masked edge tile.
    N2, C2, H2, W2 = 1, 8, 20, 20
    kx2, ky2 = jax.random.split(k3)
    input_l2 = jax.random.normal(kx2, (N2, C2, H2, W2), dtype=jnp.float32)
    input_r2 = jax.random.normal(ky2, (N2, C2, H2, W2), dtype=jnp.float32)
    w_l2, b_l2, w_r2, b_r2 = _make_params(k2, C2)

    for tile in (None, 128):
        out_l2, out_r2 = positive_ytmt_head(
            input_l2, input_r2, w_l2, b_l2, w_r2, b_r2, tm=tile)
        jax.block_until_ready((out_l2, out_r2))
        ref_l2, ref_r2 = _reference(input_l2, input_r2, w_l2, b_l2, w_r2, b_r2)
        assert out_l2.shape == (N2, C2, H2, W2)
        assert jnp.allclose(out_l2, ref_l2, atol=1e-5, rtol=1e-5)
        assert jnp.allclose(out_r2, ref_r2, atol=1e-5, rtol=1e-5)

    print("KERNEL_OK")
</pallas_src>

<mosaic_0001>
module attributes {stable_mosaic.version = 11 : i64} {
  func.func @_ytmt_head_kernel_split(%arg0: i32, %arg1: i32, %arg2: memref<1x4x256xf32, #tpu.memory_space<vmem>>, %arg3: memref<1x4x256xf32, #tpu.memory_space<vmem>>, %arg4: memref<4x4xf32, #tpu.memory_space<vmem>>, %arg5: memref<4x4xf32, #tpu.memory_space<vmem>>, %arg6: memref<4x4xf32, #tpu.memory_space<vmem>>, %arg7: memref<4x4xf32, #tpu.memory_space<vmem>>, %arg8: memref<4x1xf32, #tpu.memory_space<vmem>>, %arg9: memref<4x1xf32, #tpu.memory_space<vmem>>, %arg10: memref<1x4x256xf32, #tpu.memory_space<vmem>>, %arg11: memref<1x4x256xf32, #tpu.memory_space<vmem>>) attributes {dimension_semantics = [#tpu.dimension_semantics<parallel>, #tpu.dimension_semantics<parallel>], iteration_bounds = array<i64: 2, 1>, scalar_prefetch = 0 : i64, scratch_operands = 0 : i64, tpu.core_type = #tpu.core_type<tc>, window_params = [{transform_indices = @transform_0, window_bounds = array<i64: 1, 4, 256>}, {transform_indices = @transform_1, window_bounds = array<i64: 1, 4, 256>}, {pipeline_mode = #tpu.pipeline_mode<synchronous>, transform_indices = @transform_2, window_bounds = array<i64: 4, 4>}, {pipeline_mode = #tpu.pipeline_mode<synchronous>, transform_indices = @transform_3, window_bounds = array<i64: 4, 4>}, {pipeline_mode = #tpu.pipeline_mode<synchronous>, transform_indices = @transform_4, window_bounds = array<i64: 4, 4>}, {pipeline_mode = #tpu.pipeline_mode<synchronous>, transform_indices = @transform_5, window_bounds = array<i64: 4, 4>}, {pipeline_mode = #tpu.pipeline_mode<synchronous>, transform_indices = @transform_6, window_bounds = array<i64: 4, 1>}, {pipeline_mode = #tpu.pipeline_mode<synchronous>, transform_indices = @transform_7, window_bounds = array<i64: 4, 1>}, {transform_indices = @transform_8, window_bounds = array<i64: 1, 4, 256>}, {transform_indices = @transform_9, window_bounds = array<i64: 1, 4, 256>}]} {
    %c0 = arith.constant 0 : index
    %c0_0 = arith.constant 0 : index
    %c0_1 = arith.constant 0 : index
    %0 = vector.load %arg2[%c0, %c0_0, %c0_1] : memref<1x4x256xf32, #tpu.memory_space<vmem>>, vector<1x4x256xf32>
    %1 = vector.shape_cast %0 : vector<1x4x256xf32> to vector<4x256xf32>
    %cst = arith.constant 0.000000e+00 : f32
    %2 = vector.broadcast %cst : f32 to vector<4x256xf32>
    %3 = arith.maximumf %1, %2 : vector<4x256xf32>
    %c0_2 = arith.constant 0 : index
    %c0_3 = arith.constant 0 : index
    %c0_4 = arith.constant 0 : index
    %4 = vector.load %arg3[%c0_2, %c0_3, %c0_4] : memref<1x4x256xf32, #tpu.memory_space<vmem>>, vector<1x4x256xf32>
    %5 = vector.shape_cast %4 : vector<1x4x256xf32> to vector<4x256xf32>
    %cst_5 = arith.constant 0.000000e+00 : f32
    %6 = vector.broadcast %cst_5 : f32 to vector<4x256xf32>
    %7 = arith.maximumf %5, %6 : vector<4x256xf32>
    %c0_6 = arith.constant 0 : index
    %c0_7 = arith.constant 0 : index
    %8 = vector.load %arg4[%c0_6, %c0_7] : memref<4x4xf32, #tpu.memory_space<vmem>>, vector<4x4xf32>
    %cst_8 = arith.constant dense<0.000000e+00> : vector<4x256xf32>
    %9 = tpu.matmul %8, %3, %cst_8 {dimension_numbers = #tpu.dot_dimension_numbers<[1], [0], [0], [1], [0, 0, 1, 1], [], []>} : vector<4x4xf32>, vector<4x256xf32>, vector<4x256xf32> -> vector<4x256xf32>
    %c0_9 = arith.constant 0 : index
    %c0_10 = arith.constant 0 : index
    %10 = vector.load %arg5[%c0_9, %c0_10] : memref<4x4xf32, #tpu.memory_space<vmem>>, vector<4x4xf32>
    %cst_11 = arith.constant dense<0.000000e+00> : vector<4x256xf32>
    %11 = tpu.matmul %10, %7, %cst_11 {dimension_numbers = #tpu.dot_dimension_numbers<[1], [0], [0], [1], [0, 0, 1, 1], [], []>} : vector<4x4xf32>, vector<4x256xf32>, vector<4x256xf32> -> vector<4x256xf32>
    %12 = arith.addf %9, %11 : vector<4x256xf32>
    %c0_12 = arith.constant 0 : index
    %c0_13 = arith.constant 0 : index
    %13 = vector.load %arg8[%c0_12, %c0_13] : memref<4x1xf32, #tpu.memory_space<vmem>>, vector<4x1xf32>
    %14 = vector.broadcast %13 : vector<4x1xf32> to vector<4x256xf32>
    %15 = arith.addf %12, %14 : vector<4x256xf32>
    %c0_14 = arith.constant 0 : index
    %c0_15 = arith.constant 0 : index
    %16 = vector.load %arg6[%c0_14, %c0_15] : memref<4x4xf32, #tpu.memory_space<vmem>>, vector<4x4xf32>
    %cst_16 = arith.constant dense<0.000000e+00> : vector<4x256xf32>
    %17 = tpu.matmul %16, %7, %cst_16 {dimension_numbers = #tpu.dot_dimension_numbers<[1], [0], [0], [1], [0, 0, 1, 1], [], []>} : vector<4x4xf32>, vector<4x256xf32>, vector<4x256xf32> -> vector<4x256xf32>
    %c0_17 = arith.constant 0 : index
    %c0_18 = arith.constant 0 : index
    %18 = vector.load %arg7[%c0_17, %c0_18] : memref<4x4xf32, #tpu.memory_space<vmem>>, vector<4x4xf32>
    %cst_19 = arith.constant dense<0.000000e+00> : vector<4x256xf32>
    %19 = tpu.matmul %18, %3, %cst_19 {dimension_numbers = #tpu.dot_dimension_numbers<[1], [0], [0], [1], [0, 0, 1, 1], [], []>} : vector<4x4xf32>, vector<4x256xf32>, vector<4x256xf32> -> vector<4x256xf32>
    %20 = arith.addf %17, %19 : vector<4x256xf32>
    %c0_20 = arith.constant 0 : index
    %c0_21 = arith.constant 0 : index
    %21 = vector.load %arg9[%c0_20, %c0_21] : memref<4x1xf32, #tpu.memory_space<vmem>>, vector<4x1xf32>
    %22 = vector.broadcast %21 : vector<4x1xf32> to vector<4x256xf32>
    %23 = arith.addf %20, %22 : vector<4x256xf32>
    %c0_22 = arith.constant 0 : index
    %c0_23 = arith.constant 0 : index
    %c0_24 = arith.constant 0 : index
    %24 = vector.load %arg10[%c0_22, %c0_23, %c0_24] : memref<1x4x256xf32, #tpu.memory_space<vmem>>, vector<1x4x256xf32>
    %25 = vector.shape_cast %24 : vector<1x4x256xf32> to vector<4x256xf32>
    %26 = vector.shape_cast %15 : vector<4x256xf32> to vector<1x4x256xf32>
    tpu.vector_store %arg10[%c0_22, %c0_23, %c0_24], %26 {strides = array<i32>} : memref<1x4x256xf32, #tpu.memory_space<vmem>>, vector<1x4x256xf32>,
    %c0_25 = arith.constant 0 : index
    %c0_26 = arith.constant 0 : index
    %c0_27 = arith.constant 0 : index
    %27 = vector.load %arg11[%c0_25, %c0_26, %c0_27] : memref<1x4x256xf32, #tpu.memory_space<vmem>>, vector<1x4x256xf32>
    %28 = vector.shape_cast %27 : vector<1x4x256xf32> to vector<4x256xf32>
    %29 = vector.shape_cast %23 : vector<4x256xf32> to vector<1x4x256xf32>
    tpu.vector_store %arg11[%c0_25, %c0_26, %c0_27], %29 {strides = array<i32>} : memref<1x4x256xf32, #tpu.memory_space<vmem>>, vector<1x4x256xf32>,
    return
  }
  func.func @transform_0(%arg0: i32, %arg1: i32) -> (i32, i32, i32) {
    %c0_i32 = arith.constant 0 : i32
    %c0_i32_0 = arith.constant 0 : i32
    return %arg0, %c0_i32, %arg1 : i32, i32, i32
  }
  func.func @transform_1(%arg0: i32, %arg1: i32) -> (i32, i32, i32) {
    %c0_i32 = arith.constant 0 : i32
    %c0_i32_0 = arith.constant 0 : i32
    return %arg0, %c0_i32, %arg1 : i32, i32, i32
  }
  func.func @transform_2(%arg0: i32, %arg1: i32) -> (i32, i32) {
    %c0_i32 = arith.constant 0 : i32
    %c0_i32_0 = arith.constant 0 : i32
    %c0_i32_1 = arith.constant 0 : i32
    return %c0_i32, %c0_i32_0 : i32, i32
  }
  func.func @transform_3(%arg0: i32, %arg1: i32) -> (i32, i32) {
    %c0_i32 = arith.constant 0 : i32
    %c0_i32_0 = arith.constant 0 : i32
    %c0_i32_1 = arith.constant 0 : i32
    return %c0_i32, %c0_i32_0 : i32, i32
  }
  func.func @transform_4(%arg0: i32, %arg1: i32) -> (i32, i32) {
    %c0_i32 = arith.constant 0 : i32
    %c0_i32_0 = arith.constant 0 : i32
    %c0_i32_1 = arith.constant 0 : i32
    return %c0_i32, %c0_i32_0 : i32, i32
  }
  func.func @transform_5(%arg0: i32, %arg1: i32) -> (i32, i32) {
    %c0_i32 = arith.constant 0 : i32
    %c0_i32_0 = arith.constant 0 : i32
    %c0_i32_1 = arith.constant 0 : i32
    return %c0_i32, %c0_i32_0 : i32, i32
  }
  func.func @transform_6(%arg0: i32, %arg1: i32) -> (i32, i32) {
    %c0_i32 = arith.constant 0 : i32
    %c0_i32_0 = arith.constant 0 : i32
    %c0_i32_1 = arith.constant 0 : i32
    return %c0_i32, %c0_i32_0 : i32, i32
  }
  func.func @transform_7(%arg0: i32, %arg1: i32) -> (i32, i32) {
    %c0_i32 = arith.constant 0 : i32
    %c0_i32_0 = arith.constant 0 : i32
    %c0_i32_1 = arith.constant 0 : i32
    return %c0_i32, %c0_i32_0 : i32, i32
  }
  func.func @transform_8(%arg0: i32, %arg1: i32) -> (i32, i32, i32) {
    %c0_i32 = arith.constant 0 : i32
    %c0_i32_0 = arith.constant 0 : i32
    return %arg0, %c0_i32, %arg1 : i32, i32, i32
  }
  func.func @transform_9(%arg0: i32, %arg1: i32) -> (i32, i32, i32) {
    %c0_i32 = arith.constant 0 : i32
    %c0_i32_0 = arith.constant 0 : i32
    return %arg0, %c0_i32, %arg1 : i32, i32, i32
  }
}

</mosaic_0001>

<bundles_post_ra>
// kernel: positive_ytmt_head.1
= control target key start
LH: loop header
LB: loop body
LE: loop exit
PB: predicated region body
PF: predicated region fallthrough
CT: control target
= control target key end

     0   :  { %s1069_s30 = smov 0   ;;  %s1071_s10 = smov 0   ;;  %s1144_s0 = inlined_call_operand.vmem [shape: f32[2,4,256], index: 0, kind: input, shape index: {}]   ;;  %s1145_s1 = inlined_call_operand.vmem [shape: f32[2,4,256], index: 1, kind: input, shape index: {}]   ;;  %s1146_s2 = inlined_call_operand.vmem [shape: f32[4,4], index: 2, kind: input, shape index: {}]   ;;  %s1147_s3 = inlined_call_operand.vmem [shape: f32[4,4], index: 3, kind: input, shape index: {}]   ;;  %s1148_s4 = inlined_call_operand.vmem [shape: f32[4,4], index: 4, kind: input, shape index: {}]   ;;  %s1149_s5 = inlined_call_operand.vmem [shape: f32[4,4], index: 5, kind: input, shape index: {}]   ;;  %s1150_s6 = inlined_call_operand.vmem [shape: f32[4,1], index: 6, kind: input, shape index: {}]   ;;  %s1151_s7 = inlined_call_operand.vmem [shape: f32[4,1], index: 7, kind: input, shape index: {}]   ;;  %s1152_s8 = inlined_call_operand.vmem [shape: f32[2,4,256], index: 8, kind: output, shape index: {0}]   ;;  %s1153_s9 = inlined_call_operand.vmem [shape: f32[2,4,256], index: 9, kind: output, shape index: {1}]  }
   0x1   :  { %s1073_s11 = smov 0  }
   0x2 LB: > { %s32_s12 = sadd.s32 1, %s1011_s10  ;;  %p935_p0 = scmp.ge.s32.totalorder %s1015_s11, 1  ;;  %s1015_s11 = sphi %s1073_s11, %s20_s11   ;;  %s1011_s10 = sphi %s1071_s10, %s1155_s10   ;;  %s1007_s30 = sphi %s1069_s30, %s1154_s30  }
   0x3   : > { %p34_p1 = scmp.ge.s32.totalorder %s32_s12, 2  ;;  %p330_p2 = scmp.lt.s32.totalorder %s1015_s11, 3 }
   0x5   : > { %s1157_s12 = smov (%p34_p1, %s32_s12), 0  ;;  %p331_p3 = pnand %p935_p0, %p330_p2 }
   0x6   : > { %p393_p4 = scmp.lt.s32.totalorder (!%p331_p3), %s1007_s30, 1  ;;  %v1017_v0 = vmov (!%p331_p3), 0.0   ;;  %v600_v1 = vld [vmem:[%s1150_s6] sm:$0xf] (!%p331_p3)  ;;  %v1018_v2 = vmov (!%p331_p3), 0   ;;  %vm444_vm0 = vcmask (!%p331_p3), 1043456  }
   0x7   : > { %334 = sbr.rel (%p331_p3) target bundleno = 251 (0xfb), region = 52  ;;  %513 = vmatprep.mubr.f32.mxu0 (!%p331_p3), %v1017_v0  ;;  %677 = vmatprep.mubr.f32.mxu1 (!%p331_p3), %v1017_v0  ;;  %v758_v3 = vld [vmem:[%s1151_s7] sm:$0xf] (!%p331_p3)  ;;  %vm440_vm1 = vcmask (!%p331_p3), 31744  }
   0x8   : > { %992 = vset.pattern.permute.xlu0 (!%p331_p3), %v1018_v2  ;;  %v437_v10 = vld [vmem:[%s1147_s3] sm:$0xf] (!%p331_p3) }
   0x9   : > { %603 = vperm.xlu0 (!%p331_p3), %992, %v600_v1   ;;  %v609_v11 = vld [vmem:[%s1149_s5] sm:$0xf] (!%p331_p3) }
   0xa   : > { %v436_v12 = vld [vmem:[%s1146_s2] sm:$0xf] (!%p331_p3) }
   0xb   : > { %v608_v13 = vld [vmem:[%s1148_s4] sm:$0xf] (!%p331_p3) }
   0xd   : > { %761 = vperm.xlu0 (!%p331_p3), %992, %v758_v3  }
   0xe   : > { %s1159_s30 = smov (!%p393_p4, %s1007_s30), 1 }
   0xf   : > { %s1090_s15 = sshll.u32 %s1159_s30, 3 }
  0x10   : > { %s410_s18 = scalar_lea.vmem %s1145_s1, %s1090_s15  ;;  %s400_s21 = scalar_lea.vmem %s1144_s0, %s1090_s15 }
  0x11   : > { %v434_v4 = vld [vmem:[%s410_s18] sm:$0xff]  ;;  %s420_s17 = scalar_lea.vmem %s1152_s8, %s1090_s15  ;;  %s430_s20 = scalar_lea.vmem %s1153_s9, %s1090_s15 }
  0x12   : > { %v432_v5 = vld [vmem:[%s400_s21] sm:$0xff]  ;;  %v435_v6 = vmax.f32 %v434_v4, 0.0 }
  0x13   : > { %v433_v7 = vmax.f32 %v432_v5, 0.0 }
  0x14   : > { %v439_v8 = vcombine.high %v435_v6, %v435_v6 }
  0x15   : > { %v521_v9 = vcombine.high %v433_v7, %v433_v7 }
  0x16   : > { %944 = vmatprep.subr.msk.mxu0 %vm444_vm0, %v439_v8 }
  0x17   : > { %950 = vmatprep.subr.msk.mxu1 %vm444_vm0, %v521_v9  ;;  %945 = vmatpush1.msk.msra.mxu0 %vm444_vm0, %v435_v6 }
  0x18   : > { %951 = vmatpush1.msk.msra.mxu1 %vm444_vm0, %v433_v7  ;;  %946 = vmatmul.mubr.msk.f32.vlgmr.msra.gmra.mrb[0].mxu0 %vm440_vm1, %v437_v10 }
  0x19   : > { %947 = vmatprep.subr.msk.mxu0 %vm444_vm0, %v521_v9  ;;  %952 = vmatmul.mubr.msk.f32.vlgmr.msra.gmra.mrb[0].mxu1 %vm440_vm1, %v609_v11 }
  0x1a   : > { %953 = vmatprep.subr.msk.mxu1 %vm444_vm0, %v439_v8  ;;  %948 = vmatpush1.msk.msra.mxu0 %vm444_vm0, %v433_v7 }
  0x1b   : > { %954 = vmatpush1.msk.msra.mxu1 %vm444_vm0, %v435_v6  ;;  %593 = vmatprep.mubr.f32.mxu0 %v1017_v0 }
  0x1c   : > { %751 = vmatprep.mubr.f32.mxu1 %v1017_v0 }
  0x20   : > { %949 = vmatmul.mubr.msk.f32.vlgmr.msra.gmra.mrb[0].mxu0 %vm440_vm1, %v436_v12 }
  0x21   : > { %955 = vmatmul.mubr.msk.f32.vlgmr.msra.gmra.mrb[0].mxu1 %vm440_vm1, %v608_v13 }
  0x88   : > { %v604_v14 = vpop.permute.xlu0 %603 }
  0x8c   : > { %v762_v15 = vpop.permute.xlu0 %761 }
  0xf3   : > { %v595_v16 = vpop.f32.mrb[0].mxu0 }
  0xf4   : > { %v606_v17 = vadd.f32 %v604_v14, %v595_v16  ;;  %v753_v18 = vpop.f32.mrb[0].mxu1  ;;  %v597_v19 = vpop.f32.mrb[1].mxu0 }
  0xf5   : > { %v764_v20 = vadd.f32 %v762_v15, %v753_v18  ;;  %v607_v21 = vadd.f32 %v604_v14, %v597_v19  ;;  %v755_v22 = vpop.f32.mrb[1].mxu1 }
  0xf6   : > { %v765_v23 = vadd.f32 %v762_v15, %v755_v22 }
  0xf7   : > { %v768_v24 = vcombine.low %v606_v17, %v607_v21 }
  0xf8   : > { %v773_v25 = vcombine.low %v764_v20, %v765_v23 }
  0xf9   : > { %770 = vst [vmem:[%s420_s17] sm:$0xff] %v768_v24 }
  0xfa   : > { %775 = vst [vmem:[%s430_s20] sm:$0xff] %v773_v25 }
  0xfb PF: > { %s20_s11 = sadd.s32 1, %s1015_s11   ;;  %s1154_s30 = smov %s1011_s10 }
  0xfc   : > { %p17_p5 = scmp.ge.s32.totalorder %s20_s11, 4   ;;  %s1155_s10 = smov %s1157_s12 }
  0xfe   :  { %19 = sbr.rel (!%p17_p5) target bundleno = 2 (0x2), region = 97 }

</bundles_post_ra>
